<compile_context>
chip_gen: v5e
topology: v5e:2x2
jax: 0.10.0
libtpu: 0.0.40
codegen_flags: <defaults>
</compile_context>

<pallas_src>
import functools

import numpy as np
import jax
import jax.numpy as jnp
from jax.experimental import pallas as pl
from jax.experimental.pallas import tpu as pltpu


def _convbn_kernel(x_ref, w_ref, shift_ref, o_ref, *,
                   kh, stride, dilation, th, owp, sub_th, sub_ow, w_resident):
    """One (image*row-tile, cout-tile) grid step.

    x_ref:     (1, band, OWp, kw*Cin)          bf16  halo'd input row band
    w_ref:     (cout_tiles|1, kh, kw*Cin, TN)  bf16  BN-scale-folded weight
    shift_ref: (cout_tiles, 1, TN)             f32   BN shift
    o_ref:     (1, th, OWp, TN)                f32   output tile
    """
    j = pl.program_id(2)
    wj = j if w_resident else 0
    sh = shift_ref[j]                                   # (1, TN) f32
    tn = o_ref.shape[3]

    # Register-sized M sub-blocks; tap (ki) loop innermost so the accumulator
    # never round-trips VMEM between matmuls.
    for rs0 in range(0, th, sub_th):
        nr = min(sub_th, th - rs0)
        for c0 in range(0, owp, sub_ow):
            nc = min(sub_ow, owp - c0)
            acc = None
            for ki in range(kh):
                r0 = rs0 * stride + ki * dilation
                rows = pl.ds(r0, nr) if stride == 1 else pl.ds(r0, nr, stride)
                patch = x_ref[0, rows, pl.ds(c0, nc), :]        # (nr, nc, kw*Cin)
                patch = patch.reshape(nr * nc, patch.shape[-1])
                contrib = jnp.dot(patch, w_ref[wj, ki],
                                  preferred_element_type=jnp.float32)
                acc = contrib if acc is None else acc + contrib
            out = (acc + sh).astype(o_ref.dtype).reshape(nr, nc, tn)
            o_ref[0, pl.ds(rs0, nr), pl.ds(c0, nc), :] = out


def _round_up(x, m):
    return (x + m - 1) // m * m


def convbn_forward(x_nchw, weight, gamma, beta, running_mean, running_var,
                   *, stride=1, padding=0, dilation=1, eps=1e-5):
    """ConvBN forward (groups=1, deploy=False, nonlinear=Identity).

    x_nchw: (N, Cin, H, W) f32, weight: (Cout, Cin, KH, KW) f32
    returns (N, Cout, OH, OW) f32
    """
    n, cin, h, w = x_nchw.shape
    cout, cin_w, kh, kw = weight.shape
    # TODO(synk): grouped convolution (groups > 1) is not implemented.
    assert cin_w == cin, "groups != 1 is not supported"

    # ---- BN folding (transI_fusebn): fold scale into the weight, keep shift.
    scale = gamma / jnp.sqrt(running_var + eps)              # (Cout,)
    shift = beta - running_mean * scale                      # (Cout,)
    w_fold = weight * scale[:, None, None, None]             # (Cout, Cin, KH, KW)

    # ---- Output geometry.
    oh = (h + 2 * padding - dilation * (kh - 1) - 1) // stride + 1
    ow = (w + 2 * padding - dilation * (kw - 1) - 1) // stride + 1

    # ---- Tiling.
    owp = _round_up(ow, 16)            # bf16 sublane tile -> layout-free reshapes
    kwcin = kw * cin                   # merged MXU contraction (K) dim
    tn = 128                           # lane-dense output, register-sized acc
    cout_pad = _round_up(cout, tn)
    cout_tiles = cout_pad // tn
    # Output sub-block: <=256 M rows -> <=128 KiB f32 accumulator.
    sub_ow = min(owp, 256)
    sub_th = max(1, 192 // sub_ow)
    # Output rows per grid step: ~1024 M rows to amortize per-step overhead.
    th = min(oh, max(sub_th, 1024 // owp))
    row_tiles = pl.cdiv(oh, th)
    oh_pad = row_tiles * th
    band = (th - 1) * stride + dilation * (kh - 1) + 1       # halo'd rows / tile

    # ---- Wrapper-side layout glue (each a single pass over the input).
    h_need = (oh_pad - 1) * stride + dilation * (kh - 1) + 1
    w_need = (owp - 1) * stride + dilation * (kw - 1) + 1
    x_nhwc = jnp.transpose(x_nchw, (0, 2, 3, 1)).astype(jnp.bfloat16)
    xp = jnp.pad(x_nhwc, ((0, 0),
                          (padding, max(h_need - padding - h, 0)),
                          (padding, max(w_need - padding - w, 0)),
                          (0, 0)))
    # Merge kw taps into channels: xm[n,y,ox,kj*Cin+c] = xp[n, y, ox*s + kj*d, c].
    cols = [xp[:, :, kj * dilation: kj * dilation + (owp - 1) * stride + 1: stride, :]
            for kj in range(kw)]
    xm = jnp.concatenate(cols, axis=-1) if kw > 1 else cols[0]   # (N,h_need,OWp,kw*Cin)
    # Halo'd row bands per output-row tile -> plain non-overlapping x blocks.
    row_idx = (np.arange(row_tiles)[:, None] * (th * stride)
               + np.arange(band)[None, :]).reshape(-1)
    xb = jnp.take(xm, jnp.asarray(row_idx, dtype=jnp.int32), axis=1)
    xb = xb.reshape(n * row_tiles, band, owp, kwcin)

    # BN-folded weight: (Cout, Cin, KH, KW) -> (cout_tiles, KH, KW*Cin, TN) bf16.
    wk = jnp.transpose(w_fold, (2, 3, 1, 0)).reshape(kh, kwcin, cout)
    wk = jnp.pad(wk, ((0, 0), (0, 0), (0, cout_pad - cout))).astype(jnp.bfloat16)
    wk = wk.reshape(kh, kwcin, cout_tiles, tn).transpose(2, 0, 1, 3)
    shift_t = jnp.pad(shift, (0, cout_pad - cout)).astype(jnp.float32)
    shift_t = shift_t.reshape(cout_tiles, 1, tn)

    # Whole folded weight resident in VMEM (fetched once for the whole call)
    # unless large; then stream per-cout-tile blocks instead.
    w_resident = wk.size * 2 <= 8 * 1024 * 1024
    if w_resident:
        w_spec = pl.BlockSpec(wk.shape, lambda ni, r, j: (0, 0, 0, 0))
    else:
        w_spec = pl.BlockSpec((1, kh, kwcin, tn), lambda ni, r, j: (j, 0, 0, 0))

    kernel = functools.partial(_convbn_kernel, kh=kh, stride=stride,
                               dilation=dilation, th=th, owp=owp,
                               sub_th=sub_th, sub_ow=sub_ow, w_resident=w_resident)

    # Generation-aware VMEM limit (v7x: 64 MiB physical; v5e/v6e: 128 MiB).
    try:
        cap = int(getattr(pltpu.get_tpu_info(), "vmem_capacity_bytes", 0) or 0)
    except Exception:
        cap = 0
    if cap <= 0:
        cap = 64 * 1024 * 1024
    vmem_limit = min(int(cap * 0.8), 112 * 1024 * 1024)

    flops = 2 * n * oh * ow * kh * kw * cin * cout
    bytes_accessed = (xb.size * 2 + wk.size * 2 + shift_t.size * 4
                      + n * oh_pad * owp * cout_pad * 4)

    out = pl.pallas_call(
        kernel,
        out_shape=jax.ShapeDtypeStruct((n, oh_pad, owp, cout_pad), jnp.float32),
        grid_spec=pltpu.PrefetchScalarGridSpec(
            num_scalar_prefetch=0,
            grid=(n, row_tiles, cout_tiles),
            in_specs=[
                pl.BlockSpec((1, band, owp, kwcin),
                             lambda ni, r, j: (ni * row_tiles + r, 0, 0, 0)),
                w_spec,
                pl.BlockSpec(shift_t.shape, lambda ni, r, j: (0, 0, 0)),
            ],
            out_specs=pl.BlockSpec((1, th, owp, tn),
                                   lambda ni, r, j: (ni, r, 0, j)),
        ),
        compiler_params=pltpu.CompilerParams(
            dimension_semantics=("parallel", "parallel", "parallel"),
            vmem_limit_bytes=vmem_limit),
        cost_estimate=pl.CostEstimate(flops=flops, transcendentals=0,
                                      bytes_accessed=bytes_accessed),
    )(xb, wk, shift_t)

    out = out[:, :oh, :ow, :cout]                               # drop padding
    # TODO(synk): emit bf16 NHWC directly for downstream consumers to avoid this
    # extra f32 slice + NCHW transpose pass over the output.
    return jnp.transpose(out, (0, 3, 1, 2))                     # -> NCHW


if __name__ == "__main__":
    key = jax.random.PRNGKey(0)
    k_x, k_w, k_g, k_b, k_m, k_v = jax.random.split(key, 6)

    # ConvBN(in_channels=4, out_channels=8, kernel_size=3, stride=1, padding=1)
    N, Cin, H, W = 2, 4, 16, 16
    Cout, KH, KW = 8, 3, 3
    stride, padding, dilation = 1, 1, 1
    eps = 1e-5

    x = jax.random.normal(k_x, (N, Cin, H, W), jnp.float32)
    weight = jax.random.normal(k_w, (Cout, Cin, KH, KW), jnp.float32) * 0.1
    gamma = jax.random.normal(k_g, (Cout,), jnp.float32) * 0.1 + 1.0
    beta = jax.random.normal(k_b, (Cout,), jnp.float32) * 0.1
    running_mean = jax.random.normal(k_m, (Cout,), jnp.float32) * 0.1
    running_var = jax.random.uniform(k_v, (Cout,), jnp.float32, 0.5, 1.5)

    y = convbn_forward(x, weight, gamma, beta, running_mean, running_var,
                       stride=stride, padding=padding, dilation=dilation, eps=eps)
    y = jax.block_until_ready(y)
    assert y.shape == (N, Cout, H, W), y.shape

    # Reference: identical math (BN folded into the weight; operands rounded to
    # bf16 exactly as the kernel sees them; f32 accumulation) via XLA conv.
    scale = gamma / jnp.sqrt(running_var + eps)
    shift = beta - running_mean * scale
    w_fold = weight * scale[:, None, None, None]
    xq = x.astype(jnp.bfloat16).astype(jnp.float32)
    wq = w_fold.astype(jnp.bfloat16).astype(jnp.float32)
    ref = jax.lax.conv_general_dilated(
        xq, wq, window_strides=(stride, stride),
        padding=[(padding, padding), (padding, padding)],
        rhs_dilation=(dilation, dilation),
        dimension_numbers=("NCHW", "OIHW", "NCHW"),
        precision=jax.lax.Precision.HIGHEST) + shift.reshape(1, Cout, 1, 1)
    err = float(jnp.max(jnp.abs(y - ref)))
    assert err < 2e-3, err

    print("KERNEL_OK")
</pallas_src>

<mosaic_0001>
module attributes {stable_mosaic.version = 11 : i64} {
  func.func @_convbn_kernel(%arg0: i32, %arg1: i32, %arg2: i32, %arg3: memref<1x18x16x12xbf16, #tpu.memory_space<vmem>>, %arg4: memref<1x3x12x128xbf16, #tpu.memory_space<vmem>>, %arg5: memref<1x1x128xf32, #tpu.memory_space<vmem>>, %arg6: memref<1x16x16x128xf32, #tpu.memory_space<vmem>>) attributes {dimension_semantics = [#tpu.dimension_semantics<parallel>, #tpu.dimension_semantics<parallel>, #tpu.dimension_semantics<parallel>], iteration_bounds = array<i64: 2, 1, 1>, scalar_prefetch = 0 : i64, scratch_operands = 0 : i64, tpu.core_type = #tpu.core_type<tc>, window_params = [{transform_indices = @transform_0, window_bounds = array<i64: 1, 18, 16, 12>}, {pipeline_mode = #tpu.pipeline_mode<synchronous>, transform_indices = @transform_1, window_bounds = array<i64: 1, 3, 12, 128>}, {pipeline_mode = #tpu.pipeline_mode<synchronous>, transform_indices = @transform_2, window_bounds = array<i64: 1, 1, 128>}, {transform_indices = @transform_3, window_bounds = array<i64: 1, 16, 16, 128>}]} {
    %0 = arith.index_cast %arg2 : i32 to index
    %c0 = arith.constant 0 : index
    %c0_0 = arith.constant 0 : index
    %1 = vector.load %arg5[%0, %c0, %c0_0] : memref<1x1x128xf32, #tpu.memory_space<vmem>>, vector<1x1x128xf32>
    %2 = vector.shape_cast %1 : vector<1x1x128xf32> to vector<1x128xf32>
    %c0_1 = arith.constant 0 : index
    %c0_2 = arith.constant 0 : index
    %c0_3 = arith.constant 0 : index
    %c0_4 = arith.constant 0 : index
    %3 = vector.load %arg3[%c0_1, %c0_2, %c0_3, %c0_4] : memref<1x18x16x12xbf16, #tpu.memory_space<vmem>>, vector<1x12x16x12xbf16>
    %4 = vector.shape_cast %3 : vector<1x12x16x12xbf16> to vector<12x16x12xbf16>
    %5 = vector.shape_cast %4 : vector<12x16x12xbf16> to vector<192x12xbf16>
    %6 = arith.index_cast %arg2 : i32 to index
    %c0_5 = arith.constant 0 : index
    %c0_6 = arith.constant 0 : index
    %c0_7 = arith.constant 0 : index
    %7 = vector.load %arg4[%6, %c0_5, %c0_6, %c0_7] : memref<1x3x12x128xbf16, #tpu.memory_space<vmem>>, vector<1x1x12x128xbf16>
    %8 = vector.shape_cast %7 : vector<1x1x12x128xbf16> to vector<12x128xbf16>
    %cst = arith.constant dense<0.000000e+00> : vector<192x128xf32>
    %9 = tpu.matmul %5, %8, %cst {dimension_numbers = #tpu.dot_dimension_numbers<[1], [0], [0], [1], [0, 0, 1, 1], [], []>} : vector<192x12xbf16>, vector<12x128xbf16>, vector<192x128xf32> -> vector<192x128xf32>
    %c0_8 = arith.constant 0 : index
    %c1 = arith.constant 1 : index
    %c0_9 = arith.constant 0 : index
    %c0_10 = arith.constant 0 : index
    %10 = vector.load %arg3[%c0_8, %c1, %c0_9, %c0_10] : memref<1x18x16x12xbf16, #tpu.memory_space<vmem>>, vector<1x12x16x12xbf16>
    %11 = vector.shape_cast %10 : vector<1x12x16x12xbf16> to vector<12x16x12xbf16>
    %12 = vector.shape_cast %11 : vector<12x16x12xbf16> to vector<192x12xbf16>
    %13 = arith.index_cast %arg2 : i32 to index
    %c1_11 = arith.constant 1 : index
    %c0_12 = arith.constant 0 : index
    %c0_13 = arith.constant 0 : index
    %14 = vector.load %arg4[%13, %c1_11, %c0_12, %c0_13] : memref<1x3x12x128xbf16, #tpu.memory_space<vmem>>, vector<1x1x12x128xbf16>
    %15 = vector.shape_cast %14 : vector<1x1x12x128xbf16> to vector<12x128xbf16>
    %cst_14 = arith.constant dense<0.000000e+00> : vector<192x128xf32>
    %16 = tpu.matmul %12, %15, %cst_14 {dimension_numbers = #tpu.dot_dimension_numbers<[1], [0], [0], [1], [0, 0, 1, 1], [], []>} : vector<192x12xbf16>, vector<12x128xbf16>, vector<192x128xf32> -> vector<192x128xf32>
    %17 = arith.addf %9, %16 : vector<192x128xf32>
    %c0_15 = arith.constant 0 : index
    %c2 = arith.constant 2 : index
    %c0_16 = arith.constant 0 : index
    %c0_17 = arith.constant 0 : index
    %18 = vector.load %arg3[%c0_15, %c2, %c0_16, %c0_17] : memref<1x18x16x12xbf16, #tpu.memory_space<vmem>>, vector<1x12x16x12xbf16>
    %19 = vector.shape_cast %18 : vector<1x12x16x12xbf16> to vector<12x16x12xbf16>
    %20 = vector.shape_cast %19 : vector<12x16x12xbf16> to vector<192x12xbf16>
    %21 = arith.index_cast %arg2 : i32 to index
    %c2_18 = arith.constant 2 : index
    %c0_19 = arith.constant 0 : index
    %c0_20 = arith.constant 0 : index
    %22 = vector.load %arg4[%21, %c2_18, %c0_19, %c0_20] : memref<1x3x12x128xbf16, #tpu.memory_space<vmem>>, vector<1x1x12x128xbf16>
    %23 = vector.shape_cast %22 : vector<1x1x12x128xbf16> to vector<12x128xbf16>
    %cst_21 = arith.constant dense<0.000000e+00> : vector<192x128xf32>
    %24 = tpu.matmul %20, %23, %cst_21 {dimension_numbers = #tpu.dot_dimension_numbers<[1], [0], [0], [1], [0, 0, 1, 1], [], []>} : vector<192x12xbf16>, vector<12x128xbf16>, vector<192x128xf32> -> vector<192x128xf32>
    %25 = arith.addf %17, %24 : vector<192x128xf32>
    %26 = vector.broadcast %2 : vector<1x128xf32> to vector<192x128xf32>
    %27 = arith.addf %25, %26 : vector<192x128xf32>
    %28 = vector.shape_cast %27 : vector<192x128xf32> to vector<12x16x128xf32>
    %c0_22 = arith.constant 0 : index
    %c0_23 = arith.constant 0 : index
    %c0_24 = arith.constant 0 : index
    %c0_25 = arith.constant 0 : index
    %29 = vector.load %arg6[%c0_22, %c0_23, %c0_24, %c0_25] : memref<1x16x16x128xf32, #tpu.memory_space<vmem>>, vector<1x12x16x128xf32>
    %30 = vector.shape_cast %29 : vector<1x12x16x128xf32> to vector<12x16x128xf32>
    %31 = vector.shape_cast %28 : vector<12x16x128xf32> to vector<1x12x16x128xf32>
    tpu.vector_store %arg6[%c0_22, %c0_23, %c0_24, %c0_25], %31 {strides = array<i32>} : memref<1x16x16x128xf32, #tpu.memory_space<vmem>>, vector<1x12x16x128xf32>,
    %c0_26 = arith.constant 0 : index
    %c12 = arith.constant 12 : index
    %c0_27 = arith.constant 0 : index
    %c0_28 = arith.constant 0 : index
    %32 = vector.load %arg3[%c0_26, %c12, %c0_27, %c0_28] : memref<1x18x16x12xbf16, #tpu.memory_space<vmem>>, vector<1x4x16x12xbf16>
    %33 = vector.shape_cast %32 : vector<1x4x16x12xbf16> to vector<4x16x12xbf16>
    %34 = vector.shape_cast %33 : vector<4x16x12xbf16> to vector<64x12xbf16>
    %35 = arith.index_cast %arg2 : i32 to index
    %c0_29 = arith.constant 0 : index
    %c0_30 = arith.constant 0 : index
    %c0_31 = arith.constant 0 : index
    %36 = vector.load %arg4[%35, %c0_29, %c0_30, %c0_31] : memref<1x3x12x128xbf16, #tpu.memory_space<vmem>>, vector<1x1x12x128xbf16>
    %37 = vector.shape_cast %36 : vector<1x1x12x128xbf16> to vector<12x128xbf16>
    %cst_32 = arith.constant dense<0.000000e+00> : vector<64x128xf32>
    %38 = tpu.matmul %34, %37, %cst_32 {dimension_numbers = #tpu.dot_dimension_numbers<[1], [0], [0], [1], [0, 0, 1, 1], [], []>} : vector<64x12xbf16>, vector<12x128xbf16>, vector<64x128xf32> -> vector<64x128xf32>
    %c0_33 = arith.constant 0 : index
    %c13 = arith.constant 13 : index
    %c0_34 = arith.constant 0 : index
    %c0_35 = arith.constant 0 : index
    %39 = vector.load %arg3[%c0_33, %c13, %c0_34, %c0_35] : memref<1x18x16x12xbf16, #tpu.memory_space<vmem>>, vector<1x4x16x12xbf16>
    %40 = vector.shape_cast %39 : vector<1x4x16x12xbf16> to vector<4x16x12xbf16>
    %41 = vector.shape_cast %40 : vector<4x16x12xbf16> to vector<64x12xbf16>
    %42 = arith.index_cast %arg2 : i32 to index
    %c1_36 = arith.constant 1 : index
    %c0_37 = arith.constant 0 : index
    %c0_38 = arith.constant 0 : index
    %43 = vector.load %arg4[%42, %c1_36, %c0_37, %c0_38] : memref<1x3x12x128xbf16, #tpu.memory_space<vmem>>, vector<1x1x12x128xbf16>
    %44 = vector.shape_cast %43 : vector<1x1x12x128xbf16> to vector<12x128xbf16>
    %cst_39 = arith.constant dense<0.000000e+00> : vector<64x128xf32>
    %45 = tpu.matmul %41, %44, %cst_39 {dimension_numbers = #tpu.dot_dimension_numbers<[1], [0], [0], [1], [0, 0, 1, 1], [], []>} : vector<64x12xbf16>, vector<12x128xbf16>, vector<64x128xf32> -> vector<64x128xf32>
    %46 = arith.addf %38, %45 : vector<64x128xf32>
    %c0_40 = arith.constant 0 : index
    %c14 = arith.constant 14 : index
    %c0_41 = arith.constant 0 : index
    %c0_42 = arith.constant 0 : index
    %47 = vector.load %arg3[%c0_40, %c14, %c0_41, %c0_42] : memref<1x18x16x12xbf16, #tpu.memory_space<vmem>>, vector<1x4x16x12xbf16>
    %48 = vector.shape_cast %47 : vector<1x4x16x12xbf16> to vector<4x16x12xbf16>
    %49 = vector.shape_cast %48 : vector<4x16x12xbf16> to vector<64x12xbf16>
    %50 = arith.index_cast %arg2 : i32 to index
    %c2_43 = arith.constant 2 : index
    %c0_44 = arith.constant 0 : index
    %c0_45 = arith.constant 0 : index
    %51 = vector.load %arg4[%50, %c2_43, %c0_44, %c0_45] : memref<1x3x12x128xbf16, #tpu.memory_space<vmem>>, vector<1x1x12x128xbf16>
    %52 = vector.shape_cast %51 : vector<1x1x12x128xbf16> to vector<12x128xbf16>
    %cst_46 = arith.constant dense<0.000000e+00> : vector<64x128xf32>
    %53 = tpu.matmul %49, %52, %cst_46 {dimension_numbers = #tpu.dot_dimension_numbers<[1], [0], [0], [1], [0, 0, 1, 1], [], []>} : vector<64x12xbf16>, vector<12x128xbf16>, vector<64x128xf32> -> vector<64x128xf32>
    %54 = arith.addf %46, %53 : vector<64x128xf32>
    %55 = vector.broadcast %2 : vector<1x128xf32> to vector<64x128xf32>
    %56 = arith.addf %54, %55 : vector<64x128xf32>
    %57 = vector.shape_cast %56 : vector<64x128xf32> to vector<4x16x128xf32>
    %c0_47 = arith.constant 0 : index
    %c12_48 = arith.constant 12 : index
    %c0_49 = arith.constant 0 : index
    %c0_50 = arith.constant 0 : index
    %58 = vector.load %arg6[%c0_47, %c12_48, %c0_49, %c0_50] : memref<1x16x16x128xf32, #tpu.memory_space<vmem>>, vector<1x4x16x128xf32>
    %59 = vector.shape_cast %58 : vector<1x4x16x128xf32> to vector<4x16x128xf32>
    %60 = vector.shape_cast %57 : vector<4x16x128xf32> to vector<1x4x16x128xf32>
    tpu.vector_store %arg6[%c0_47, %c12_48, %c0_49, %c0_50], %60 {strides = array<i32>} : memref<1x16x16x128xf32, #tpu.memory_space<vmem>>, vector<1x4x16x128xf32>,
    return
  }
  func.func @transform_0(%arg0: i32, %arg1: i32, %arg2: i32) -> (i32, i32, i32, i32) {
    %c1_i32 = arith.constant 1 : i32
    %0 = arith.muli %arg0, %c1_i32 : i32
    %1 = arith.addi %0, %arg1 : i32
    %c0_i32 = arith.constant 0 : i32
    %c0_i32_0 = arith.constant 0 : i32
    %c0_i32_1 = arith.constant 0 : i32
    %c0_i32_2 = arith.constant 0 : i32
    return %1, %c0_i32, %c0_i32_0, %c0_i32_1 : i32, i32, i32, i32
  }
  func.func @transform_1(%arg0: i32, %arg1: i32, %arg2: i32) -> (i32, i32, i32, i32) {
    %c0_i32 = arith.constant 0 : i32
    %c0_i32_0 = arith.constant 0 : i32
    %c0_i32_1 = arith.constant 0 : i32
    %c0_i32_2 = arith.constant 0 : i32
    %c0_i32_3 = arith.constant 0 : i32
    return %c0_i32, %c0_i32_0, %c0_i32_1, %c0_i32_2 : i32, i32, i32, i32
  }
  func.func @transform_2(%arg0: i32, %arg1: i32, %arg2: i32) -> (i32, i32, i32) {
    %c0_i32 = arith.constant 0 : i32
    %c0_i32_0 = arith.constant 0 : i32
    %c0_i32_1 = arith.constant 0 : i32
    %c0_i32_2 = arith.constant 0 : i32
    return %c0_i32, %c0_i32_0, %c0_i32_1 : i32, i32, i32
  }
  func.func @transform_3(%arg0: i32, %arg1: i32, %arg2: i32) -> (i32, i32, i32, i32) {
    %c0_i32 = arith.constant 0 : i32
    %c0_i32_0 = arith.constant 0 : i32
    return %arg0, %arg1, %c0_i32, %arg2 : i32, i32, i32, i32
  }
}

</mosaic_0001>

<bundles_post_ra>
// kernel: tpu_custom_call.1
= control target key start
LH: loop header
LB: loop body
LE: loop exit
PB: predicated region body
PF: predicated region fallthrough
CT: control target
= control target key end

     0   :  { %8 = vsyncpa [#allocation3], 0  ;;  %s2202_s0 = inlined_call_operand.vmem [shape: bf16[2,18,16,12], index: 0, kind: input, shape index: {}]   ;;  %s2203_s1 = inlined_call_operand.vmem [shape: bf16[1,3,12,128], index: 1, kind: input, shape index: {}]   ;;  %s2204_s2 = inlined_call_operand.vmem [shape: f32[1,1,128], index: 2, kind: input, shape index: {}]   ;;  %s2205_s3 = inlined_call_operand.hbm [shape: f32[2,16,16,128], index: 3, kind: output, shape index: {}]  }
   0x1   :  { %10 = vsyncpa [#allocation3 + $0x1], 0  ;;  %s1841_s12 = smov 0   ;;  %s1843_s13 = smov 0  }
   0x2   :  { %s1845_s14 = smov 0   ;;  %s1847_s15 = smov 0  }
   0x3   :  { %s1849_s16 = smov 0   ;;  %s1851_s17 = smov 0  }
   0x4 LB: > { %s1261_s18 = sadd.s32 4294967295, %s1817_s17   ;;  %s1262_s19 = sadd.s32 4294967294, %s1817_s17   ;;  %s1817_s17 = sphi %s1851_s17, %s16_s17   ;;  %s1813_s16 = sphi %s1849_s16, %s2212_s16   ;;  %s1809_s15 = sphi %s1847_s15, %s2211_s15   ;;  %s1805_s14 = sphi %s1845_s14, %s2210_s14   ;;  %s1801_s13 = sphi %s1843_s13, %s2209_s13   ;;  %s1797_s12 = sphi %s1841_s12, %s2208_s12  }
   0x5   : > { %s35_s20 = sadd.s32 1, %s1813_s16  ;;  %s116_s21 = sadd.s32 1, %s1805_s14 }
   0x6   : > { %p37_p0 = scmp.ge.s32.totalorder %s35_s20, 2  ;;  %p126_p1 = scmp.ne.s32.totalorder %s1805_s14, %s1801_s13 }
   0x7   : > { %p127_p2 = scmp.eq.s32.totalorder %s1261_s18, 1  ;;  %p132_p3 = scmp.ne.s32.totalorder %s1801_s13, %s1797_s12 }
   0x8   : > { %s2214_s20 = smov (%p37_p0, %s35_s20), 0  ;;  %p133_p5 = scmp.eq.s32.totalorder %s1262_s19, 1 }
   0x9   : > { %p1881_p4 = por %p127_p2, %p126_p1  ;;  %s109_s23 = ssub.s32 %s1813_s16, %s2214_s20 }
   0xa   : > { %p1265_p6 = scmp.ge.s32.totalorder %s1817_s17, 1  ;;  %p114_p7 = scmp.eq.s32.totalorder %s109_s23, 0 }
   0xb   : > { %p1888_p8 = por %p133_p5, %p132_p3  ;;  %p167_p9 = scmp.lt.s32.totalorder %s1817_s17, 3 }
   0xc   : > { %s1894_s25 = scalar_select %p114_p7, %s1805_s14, %s116_s21  }
   0xd   : > { %p168_p10 = pnand %p1265_p6, %p167_p9 }
   0xe   : > { %p193_p11 = scmp.lt.s32.totalorder (!%p168_p10), %s1809_s15, 1  ;;  %s189_s11 = sand.u32 (!%p168_p10), 1, %s1801_s13  }
   0xf   : > { %171 = sbr.rel (%p168_p10) target bundleno = 354 (0x162), region = 32  ;;  %s1266_s18 = sshll.u32 (!%p168_p10), %s189_s11, 8 }
  0x10   : > { %s1679_s26 = sshll.u32 (!%p168_p10), %s1809_s15, 8  ;;  %s1154_s4 = scalar_lea.sflag (!%p168_p10), [#allocation3], %s189_s11 }
  0x11   : > { %s1169_s29 = scalar_lea.hbm (!%p168_p10), %s2205_s3, %s1679_s26  ;;  %s1759_s9 = scalar_lea.hbm (!%p168_p10), %s2205_s3, 512 }
  0x14   : > { %v1344_v0 = vld [vmem:[%s2203_s1 + $0x8] sm:$0xf]  ;;  %v1650_v1 = vld [vmem:[%s2203_s1 + $0x8] sm:$0x30]  ;;  %vm364_vm0 = vcmask 1045504   ;;  %s194_s23 = scalar_select %p193_p11, %s1809_s15, 1 }
  0x15   : > { %v1345_v2 = vor.u32 %v1650_v1, %v1344_v0  ;;  %v1408_v3 = vld [vmem:[%s2203_s1] sm:$0xf]  ;;  %v1637_v4 = vld [vmem:[%s2203_s1] sm:$0x30]  ;;  %v1498_v5 = vld [vmem:[%s2203_s1 + $0x10] sm:$0xf] }
  0x16   : > { %v1409_v6 = vor.u32 %v1637_v4, %v1408_v3  ;;  %v1663_v7 = vld [vmem:[%s2203_s1 + $0x10] sm:$0x30]  ;;  %v1548_v8 = vld [vmem:[%s2203_s1 + $0x8] sm:$0xf]  ;;  %v1673_v9 = vld [vmem:[%s2203_s1 + $0x8] sm:$0x30] }
  0x17   : > { %v366_v10 = vsel %vm364_vm0, %v1345_v2, 0  ;;  %v1499_v11 = vor.u32 %v1663_v7, %v1498_v5  ;;  %v1549_v12 = vor.u32 %v1673_v9, %v1548_v8  ;;  %v1572_v13 = vld [vmem:[%s2203_s1] sm:$0xf]  ;;  %v1668_v15 = vld [vmem:[%s2203_s1] sm:$0x30]  ;;  %s1680_s30 = smul.u32 144, %s194_s23 }
  0x18   : > { %375 = vmatpush.bf16.msra.mxu0 %v366_v10  ;;  %v539_v14 = vsel %vm364_vm0, %v1409_v6, 0  ;;  %v1573_v18 = vor.u32 %v1668_v15, %v1572_v13  ;;  %vm327_vm1 = vcmask 97280   ;;  %v1606_v32 = vld [vmem:[%s2203_s1 + $0x10] sm:$0xf]  ;;  %v1678_v33 = vld [vmem:[%s2203_s1 + $0x10] sm:$0x30] }
  0x19   : > { %548 = vmatpush.bf16.msra.mxu1 %v539_v14  ;;  %v742_v16 = vsel %vm364_vm0, %v1499_v11, 0  ;;  %v948_v17 = vsel %vm364_vm0, %v1549_v12, 0  ;;  %s1935_s6 = scalar_lea.vmem %s2202_s0, %s1680_s30  ;;  %v1607_v34 = vor.u32 %v1678_v33, %v1606_v32  ;;  %v2023_v63 = vld [vmem:[%s2204_s2] ss:$0 sm:$0xff]  ;;  %s2028_s23 = scalar_lea.vmem [#allocation2], %s1266_s18 }
  0x1a   : > { %751 = vmatpush.bf16.msra.mxu2 %v742_v16  ;;  %957 = vmatpush.bf16.msra.mxu3 %v948_v17  ;;  %v1017_v19 = vsel %vm364_vm0, %v1573_v18, 0  ;;  %v1638_v20 = vld [vmem:[%s1935_s6 + $0x8] sm:$0xff]  ;;  %v1625_v21 = vld [vmem:[%s1935_s6] sm:$0xff]  ;;  %v1651_v22 = vld [vmem:[%s1935_s6 + $0x10] sm:$0xff]  ;;  %s1170_s15 = sshll.u32 %s2028_s23, 4  ;;  %s1172_s30 = sshll.u32 %s1169_s29, 4  ;;  %s1171_s15 = int_to_ptr.vmem [resolvable:$true] %s1170_s15  ;;  %s1173_s30 = int_to_ptr.hbm [resolvable:$true] %s1172_s30 }
  0x1b   : > { %v1669_v23 = vld [vmem:[%s1935_s6 + $0x68] sm:$0xff]  ;;  %1346 = vmatmul.msk.bf16.vlgmr.msra.gmra.mxu0 %vm327_vm1, %v1638_v20  ;;  %v1639_v24 = vld [vmem:[%s1935_s6 + $0x10] sm:$0xff]  ;;  %v1652_v26 = vld [vmem:[%s1935_s6 + $0x18] sm:$0xff]  ;;  %v1097_v35 = vsel %vm364_vm0, %v1607_v34, 0  ;;  %s1753_s5 = sshra.s32 %s1173_s30, 4  ;;  %s1754_s5 = int_to_ptr.hbm [resolvable:$true] %s1753_s5 }
  0x1c   : > { %1410 = vmatmul.msk.bf16.vlgmr.msra.gmra.mxu1 %vm327_vm1, %v1625_v21  ;;  %v1626_v25 = vld [vmem:[%s1935_s6 + $0x8] sm:$0xff]  ;;  %v1670_v27 = vld [vmem:[%s1935_s6 + $0x70] sm:$0xff]  ;;  %v1640_v28 = vld [vmem:[%s1935_s6 + $0x18] sm:$0xff]  ;;  %p1760_p1 = scmp.lt.s32.totalorder %s1754_s5, %s2205_s3 }
  0x1d   : > { %1500 = vmatmul.msk.bf16.vlgmr.msra.gmra.mxu2 %vm327_vm1, %v1651_v22  ;;  %1550 = vmatmul.msk.bf16.vlgmr.msra.gmra.mxu3 %vm327_vm1, %v1669_v23  ;;  %v1627_v29 = vld [vmem:[%s1935_s6 + $0x10] sm:$0xff]  ;;  %v1653_v30 = vld [vmem:[%s1935_s6 + $0x20] sm:$0xff]  ;;  %v1671_v31 = vld [vmem:[%s1935_s6 + $0x78] sm:$0xff] }
  0x1e   : > { %1026 = vmatpush.bf16.msrb.mxu3 %v1017_v19  ;;  %v1641_v36 = vld [vmem:[%s1935_s6 + $0x20] sm:$0xff]  ;;  %v1628_v37 = vld [vmem:[%s1935_s6 + $0x18] sm:$0xff]  ;;  %v1654_v38 = vld [vmem:[%s1935_s6 + $0x28] sm:$0xff] }
  0x1f   : > { %v1672_v39 = vld [vmem:[%s1935_s6 + $0x80] sm:$0xff]  ;;  %v1642_v40 = vld [vmem:[%s1935_s6 + $0x28] sm:$0xff]  ;;  %v1655_v42 = vld [vmem:[%s1935_s6 + $0x30] sm:$0xff] }
  0x20   : > { %v1629_v41 = vld [vmem:[%s1935_s6 + $0x20] sm:$0xff]  ;;  %v1643_v44 = vld [vmem:[%s1935_s6 + $0x30] sm:$0xff]  ;;  %v1630_v45 = vld [vmem:[%s1935_s6 + $0x28] sm:$0xff] }
  0x21   : > { %v1664_v43 = vld [vmem:[%s1935_s6 + $0x60] sm:$0xff]  ;;  %v1656_v46 = vld [vmem:[%s1935_s6 + $0x38] sm:$0xff]  ;;  %v1665_v47 = vld [vmem:[%s1935_s6 + $0x68] sm:$0xff] }
  0x22   : > { %1106 = vmatpush.bf16.msra.mxu3 %v1097_v35  ;;  %v1644_v48 = vld [vmem:[%s1935_s6 + $0x38] sm:$0xff]  ;;  %v1631_v49 = vld [vmem:[%s1935_s6 + $0x30] sm:$0xff]  ;;  %v1657_v50 = vld [vmem:[%s1935_s6 + $0x40] sm:$0xff] }
  0x23   : > { %v1666_v51 = vld [vmem:[%s1935_s6 + $0x70] sm:$0xff]  ;;  %v1645_v52 = vld [vmem:[%s1935_s6 + $0x40] sm:$0xff]  ;;  %v1632_v53 = vld [vmem:[%s1935_s6 + $0x38] sm:$0xff] }
  0x24   : > { %v1658_v54 = vld [vmem:[%s1935_s6 + $0x48] sm:$0xff]  ;;  %v1667_v55 = vld [vmem:[%s1935_s6 + $0x78] sm:$0xff]  ;;  %v1633_v57 = vld [vmem:[%s1935_s6 + $0x40] sm:$0xff] }
  0x25   : > { %v1646_v56 = vld [vmem:[%s1935_s6 + $0x48] sm:$0xff]  ;;  %v1659_v60 = vld [vmem:[%s1935_s6 + $0x50] sm:$0xff]  ;;  %v1660_v14 = vld [vmem:[%s1935_s6 + $0x58] sm:$0xff] }
  0x26   : > { %v1674_v61 = vld [vmem:[%s1935_s6 + $0x70] sm:$0xff]  ;;  %v1634_v10 = vld [vmem:[%s1935_s6 + $0x48] sm:$0xff]  ;;  %v1675_v15 = vld [vmem:[%s1935_s6 + $0x78] sm:$0xff] }
  0x27   : > { %v1647_v9 = vld [vmem:[%s1935_s6 + $0x50] sm:$0xff]  ;;  %v1661_v32 = vld [vmem:[%s1935_s6 + $0x60] sm:$0xff] }
  0x28   : > { %v1676_v33 = vld [vmem:[%s1935_s6 + $0x80] sm:$0xff] }
  0x2b   : > { %1347 = vmatmul.msk.bf16.gmra.mxu0 %vm327_vm1, %v1639_v24 }
  0x2c   : > { %1411 = vmatmul.msk.bf16.gmra.mxu1 %vm327_vm1, %v1626_v25 }
  0x2d   : > { %1501 = vmatmul.msk.bf16.gmra.mxu2 %vm327_vm1, %v1652_v26  ;;  %1551 = vmatmul.msk.bf16.gmra.mxu3 %vm327_vm1, %v1670_v27  ;;  %v1648_v27 = vld [vmem:[%s1935_s6 + $0x58] sm:$0xff] }
  0x3b   : > { %1348 = vmatmul.msk.bf16.gmra.mxu0 %vm327_vm1, %v1640_v28  ;;  %v1635_v28 = vld [vmem:[%s1935_s6 + $0x50] sm:$0xff] }
  0x3c   : > { %1412 = vmatmul.msk.bf16.gmra.mxu1 %vm327_vm1, %v1627_v29 }
  0x3d   : > { %1502 = vmatmul.msk.bf16.gmra.mxu2 %vm327_vm1, %v1653_v30  ;;  %1552 = vmatmul.msk.bf16.gmra.mxu3 %vm327_vm1, %v1671_v31 }
  0x4b   : > { %1349 = vmatmul.msk.bf16.gmra.mxu0 %vm327_vm1, %v1641_v36 }
  0x4c   : > { %1413 = vmatmul.msk.bf16.gmra.mxu1 %vm327_vm1, %v1628_v37 }
  0x4d   : > { %1503 = vmatmul.msk.bf16.gmra.mxu2 %vm327_vm1, %v1654_v38  ;;  %1553 = vmatmul.msk.bf16.gmra.mxu3 %vm327_vm1, %v1672_v39 }
  0x5b   : > { %1350 = vmatmul.msk.bf16.gmra.mxu0 %vm327_vm1, %v1642_v40 }
  0x5c   : > { %1414 = vmatmul.msk.bf16.gmra.mxu1 %vm327_vm1, %v1629_v41 }
  0x5d   : > { %1504 = vmatmul.msk.bf16.gmra.mxu2 %vm327_vm1, %v1655_v42  ;;  %1574 = vmatmul.msk.bf16.vlgmr.msrb.gmra.mxu3 %vm327_vm1, %v1664_v43 }
  0x6b   : > { %1351 = vmatmul.msk.bf16.gmra.mxu0 %vm327_vm1, %v1643_v44 }
  0x6c   : > { %1415 = vmatmul.msk.bf16.gmra.mxu1 %vm327_vm1, %v1630_v45  ;;  %v1649_v45 = vld [vmem:[%s1935_s6 + $0x60] sm:$0xff] }
  0x6d   : > { %1505 = vmatmul.msk.bf16.gmra.mxu2 %vm327_vm1, %v1656_v46  ;;  %1575 = vmatmul.msk.bf16.gmra.mxu3 %vm327_vm1, %v1665_v47  ;;  %v1636_v46 = vld [vmem:[%s1935_s6 + $0x58] sm:$0xff] }
  0x7b   : > { %1352 = vmatmul.msk.bf16.gmra.mxu0 %vm327_vm1, %v1644_v48 }
  0x7c   : > { %1416 = vmatmul.msk.bf16.gmra.mxu1 %vm327_vm1, %v1631_v49 }
  0x7d   : > { %1506 = vmatmul.msk.bf16.gmra.mxu2 %vm327_vm1, %v1657_v50  ;;  %1576 = vmatmul.msk.bf16.gmra.mxu3 %vm327_vm1, %v1666_v51  ;;  %v1662_v50 = vld [vmem:[%s1935_s6 + $0x68] sm:$0xff] }
  0x7e   : > { %v1677_v51 = vld [vmem:[%s1935_s6 + $0x88] sm:$0xff]  ;;  %s1755_s6 = scalar_lea.hbm %s1754_s5, 256 }
  0x7f   : > { %p1756_p12 = scmp.ne.s32.totalorder %s1754_s5, %s1755_s6  ;;  %p1761_p2 = scmp.lt.s32.totalorder %s1759_s9, %s1755_s6 }
  0x81   : > { %p1757_p13 = pnand %p1756_p12, %p1881_p4  ;;  %p1762_p3 = por %p1761_p2, %p1760_p1 }
  0x83   : > { %p1758_p0 = pneg %p1757_p13 }
  0x85   : > { %p1763_p5 = pnand %p1762_p3, %p1758_p0 }
  0x8b   : > { %1353 = vmatmul.msk.bf16.gmra.mxu0 %vm327_vm1, %v1645_v52 }
  0x8c   : > { %1417 = vmatmul.msk.bf16.gmra.mxu1 %vm327_vm1, %v1632_v53 }
  0x8d   : > { %1507 = vmatmul.msk.bf16.gmra.mxu2 %vm327_vm1, %v1658_v54  ;;  %1577 = vmatmul.msk.bf16.gmra.mxu3 %vm327_vm1, %v1667_v55 }
  0x98   : > { %v377_v58 = vpop.f32.mrf.mxu0 }
  0x99   : > { %v550_v59 = vpop.f32.mrf.mxu1 }
  0x9a   : > { %v551_v62 = vadd.f32 %v550_v59, %v377_v58 }
  0x9b   : > { %1354 = vmatmul.msk.bf16.gmra.mxu0 %vm327_vm1, %v1646_v56 }
  0x9c   : > { %1418 = vmatmul.msk.bf16.gmra.mxu1 %vm327_vm1, %v1633_v57 }
  0x9d   : > { %1508 = vmatmul.msk.bf16.gmra.mxu2 %vm327_vm1, %v1659_v60  ;;  %1608 = vmatmul.msk.bf16.vlgmr.msra.gmra.mxu3 %vm327_vm1, %v1674_v61 }
  0xa0   : > { %v753_v0 = vpop.f32.mrf.mxu2  ;;  %v2025_v1 = vpop.f32.mrf.mxu3 }
  0xa1   : > { %v813_v2 = vadd.f32 %v753_v0, %v551_v62  ;;  %v379_v3 = vpop.f32.mrf.mxu0  ;;  %v552_v4 = vpop.f32.mrf.mxu1 }
  0xa2   : > { %v553_v6 = vadd.f32 %v552_v4, %v379_v3 }
  0xa3   : > { %v840_v5 = vadd.f32 %v2023_v63, %v813_v2 }
  0xa5   : > { %864 = vst [vmem:[%s2028_s23] sm:$0xff] %v840_v5 }
  0xa8   : > { %v755_v7 = vpop.f32.mrf.mxu2  ;;  %v2031_v8 = vpop.f32.mrf.mxu3 }
  0xa9   : > { %v814_v11 = vadd.f32 %v755_v7, %v553_v6  ;;  %v382_v12 = vpop.f32.mrf.mxu0  ;;  %v555_v13 = vpop.f32.mrf.mxu1 }
  0xaa   : > { %v556_v17 = vadd.f32 %v555_v13, %v382_v12 }
  0xab   : > { %v841_v16 = vadd.f32 %v2023_v63, %v814_v11  ;;  %1355 = vmatmul.msk.bf16.gmra.mxu0 %vm327_vm1, %v1647_v9 }
  0xac   : > { %1419 = vmatmul.msk.bf16.gmra.mxu1 %vm327_vm1, %v1634_v10 }
  0xad   : > { %865 = vst [vmem:[%s2028_s23 + $0x8] sm:$0xff] %v841_v16  ;;  %1509 = vmatmul.msk.bf16.gmra.mxu2 %vm327_vm1, %v1660_v14  ;;  %1609 = vmatmul.msk.bf16.gmra.mxu3 %vm327_vm1, %v1675_v15 }
  0xb0   : > { %v758_v18 = vpop.f32.mrf.mxu2  ;;  %v2043_v19 = vpop.f32.mrf.mxu3 }
  0xb1   : > { %v815_v20 = vadd.f32 %v758_v18, %v556_v17  ;;  %v384_v21 = vpop.f32.mrf.mxu0  ;;  %v557_v22 = vpop.f32.mrf.mxu1 }
  0xb2   : > { %v558_v24 = vadd.f32 %v557_v22, %v384_v21 }
  0xb3   : > { %v842_v23 = vadd.f32 %v2023_v63, %v815_v20 }
  0xb5   : > { %866 = vst [vmem:[%s2028_s23 + $0x10] sm:$0xff] %v842_v23 }
  0xb8   : > { %v760_v25 = vpop.f32.mrf.mxu2  ;;  %v2047_v26 = vpop.f32.mrf.mxu3 }
  0xb9   : > { %v816_v29 = vadd.f32 %v760_v25, %v558_v24  ;;  %v387_v30 = vpop.f32.mrf.mxu0  ;;  %v560_v31 = vpop.f32.mrf.mxu1 }
  0xba   : > { %v561_v35 = vadd.f32 %v560_v31, %v387_v30 }
  0xbb   : > { %v843_v34 = vadd.f32 %v2023_v63, %v816_v29  ;;  %1356 = vmatmul.msk.bf16.gmra.mxu0 %vm327_vm1, %v1648_v27 }
  0xbc   : > { %1420 = vmatmul.msk.bf16.gmra.mxu1 %vm327_vm1, %v1635_v28 }
  0xbd   : > { %867 = vst [vmem:[%s2028_s23 + $0x18] sm:$0xff] %v843_v34  ;;  %1510 = vmatmul.msk.bf16.gmra.mxu2 %vm327_vm1, %v1661_v32  ;;  %1610 = vmatmul.msk.bf16.gmra.mxu3 %vm327_vm1, %v1676_v33 }
  0xc0   : > { %v763_v36 = vpop.f32.mrf.mxu2  ;;  %v2059_v37 = vpop.f32.mrf.mxu3 }
  0xc1   : > { %v817_v38 = vadd.f32 %v763_v36, %v561_v35  ;;  %v389_v39 = vpop.f32.mrf.mxu0  ;;  %v562_v40 = vpop.f32.mrf.mxu1 }
  0xc2   : > { %v563_v42 = vadd.f32 %v562_v40, %v389_v39 }
  0xc3   : > { %v844_v41 = vadd.f32 %v2023_v63, %v817_v38 }
  0xc5   : > { %868 = vst [vmem:[%s2028_s23 + $0x20] sm:$0xff] %v844_v41 }
  0xc8   : > { %v765_v43 = vpop.f32.mrf.mxu2  ;;  %v2063_v44 = vpop.f32.mrf.mxu3 }
  0xc9   : > { %v818_v47 = vadd.f32 %v765_v43, %v563_v42  ;;  %v392_v48 = vpop.f32.mrf.mxu0  ;;  %v565_v49 = vpop.f32.mrf.mxu1 }
  0xca   : > { %v566_v53 = vadd.f32 %v565_v49, %v392_v48 }
  0xcb   : > { %v845_v52 = vadd.f32 %v2023_v63, %v818_v47  ;;  %1357 = vmatmul.msk.bf16.gmra.mxu0 %vm327_vm1, %v1649_v45 }
  0xcc   : > { %1421 = vmatmul.msk.bf16.gmra.mxu1 %vm327_vm1, %v1636_v46 }
  0xcd   : > { %869 = vst [vmem:[%s2028_s23 + $0x28] sm:$0xff] %v845_v52  ;;  %1511 = vmatmul.msk.bf16.gmra.mxu2 %vm327_vm1, %v1662_v50  ;;  %1611 = vmatmul.msk.bf16.gmra.mxu3 %vm327_vm1, %v1677_v51 }
  0xd0   : > { %v768_v54 = vpop.f32.mrf.mxu2  ;;  %v2075_v55 = vpop.f32.mrf.mxu3 }
  0xd1   : > { %v819_v56 = vadd.f32 %v768_v54, %v566_v53  ;;  %v394_v57 = vpop.f32.mrf.mxu0  ;;  %v567_v58 = vpop.f32.mrf.mxu1 }
  0xd2   : > { %v568_v60 = vadd.f32 %v567_v58, %v394_v57 }
  0xd3   : > { %v846_v59 = vadd.f32 %v2023_v63, %v819_v56 }
  0xd5   : > { %870 = vst [vmem:[%s2028_s23 + $0x30] sm:$0xff] %v846_v59 }
  0xd8   : > { %v770_v61 = vpop.f32.mrf.mxu2  ;;  %v2079_v62 = vpop.f32.mrf.mxu3 }
  0xd9   : > { %v820_v0 = vadd.f32 %v770_v61, %v568_v60  ;;  %v397_v2 = vpop.f32.mrf.mxu0  ;;  %v570_v3 = vpop.f32.mrf.mxu1 }
  0xda   : > { %v571_v5 = vadd.f32 %v570_v3, %v397_v2 }
  0xdb   : > { %v847_v4 = vadd.f32 %v2023_v63, %v820_v0 }
  0xdd   : > { %871 = vst [vmem:[%s2028_s23 + $0x38] sm:$0xff] %v847_v4 }
  0xe0   : > { %v773_v6 = vpop.f32.mrf.mxu2  ;;  %v2083_v7 = vpop.f32.mrf.mxu3 }
  0xe1   : > { %v821_v9 = vadd.f32 %v773_v6, %v571_v5  ;;  %v399_v10 = vpop.f32.mrf.mxu0  ;;  %v572_v11 = vpop.f32.mrf.mxu1 }
  0xe2   : > { %v573_v13 = vadd.f32 %v572_v11, %v399_v10 }
  0xe3   : > { %v848_v12 = vadd.f32 %v2023_v63, %v821_v9  ;;  %v1029_v9 = vadd.f32 %v2083_v7, %v2025_v1 }
  0xe5   : > { %872 = vst [vmem:[%s2028_s23 + $0x40] sm:$0xff] %v848_v12 }
  0xe8   : > { %v775_v14 = vpop.f32.mrf.mxu2  ;;  %v2087_v15 = vpop.f32.mrf.mxu3 }
  0xe9   : > { %v822_v16 = vadd.f32 %v775_v14, %v573_v13  ;;  %v402_v17 = vpop.f32.mrf.mxu0  ;;  %v575_v18 = vpop.f32.mrf.mxu1 }
  0xea   : > { %v576_v21 = vadd.f32 %v575_v18, %v402_v17 }
  0xeb   : > { %v849_v20 = vadd.f32 %v2023_v63, %v822_v16 }
  0xed   : > { %873 = vst [vmem:[%s2028_s23 + $0x48] sm:$0xff] %v849_v20  ;;  %v1031_v20 = vadd.f32 %v2087_v15, %v2031_v8 }
  0xf0   : > { %v778_v22 = vpop.f32.mrf.mxu2  ;;  %v2091_v23 = vpop.f32.mrf.mxu3 }
  0xf1   : > { %v823_v24 = vadd.f32 %v778_v22, %v576_v21  ;;  %v404_v25 = vpop.f32.mrf.mxu0  ;;  %v577_v27 = vpop.f32.mrf.mxu1 }
  0xf2   : > { %v578_v29 = vadd.f32 %v577_v27, %v404_v25 }
  0xf3   : > { %v850_v28 = vadd.f32 %v2023_v63, %v823_v24 }
  0xf5   : > { %874 = vst [vmem:[%s2028_s23 + $0x50] sm:$0xff] %v850_v28 }
  0xf8   : > { %v780_v30 = vpop.f32.mrf.mxu2  ;;  %v2095_v31 = vpop.f32.mrf.mxu3 }
  0xf9   : > { %v824_v32 = vadd.f32 %v780_v30, %v578_v29  ;;  %v407_v33 = vpop.f32.mrf.mxu0  ;;  %v580_v34 = vpop.f32.mrf.mxu1 }
  0xfa   : > { %v581_v36 = vadd.f32 %v580_v34, %v407_v33 }
  0xfb   : > { %v851_v35 = vadd.f32 %v2023_v63, %v824_v32  ;;  %v1034_v32 = vadd.f32 %v2091_v23, %v2043_v19 }
  0xfd   : > { %875 = vst [vmem:[%s2028_s23 + $0x58] sm:$0xff] %v851_v35 }
 0x100   : > { %v783_v38 = vpop.f32.mrf.mxu2  ;;  %v2099_v39 = vpop.f32.mrf.mxu3 }
 0x101   : > { %v825_v40 = vadd.f32 %v783_v38, %v581_v36  ;;  %v409_v41 = vpop.f32.mrf.mxu0  ;;  %v582_v42 = vpop.f32.mrf.mxu1 }
 0x102   : > { %v583_v45 = vadd.f32 %v582_v42, %v409_v41  ;;  %v1036_v41 = vadd.f32 %v2095_v31, %v2047_v26 }
 0x103   : > { %v852_v43 = vadd.f32 %v2023_v63, %v825_v40 }
 0x105   : > { %876 = vst [vmem:[%s2028_s23 + $0x60] sm:$0xff] %v852_v43 }
 0x108   : > { %v785_v46 = vpop.f32.mrf.mxu2  ;;  %v2103_v47 = vpop.f32.mrf.mxu3 }
 0x109   : > { %v826_v48 = vadd.f32 %v785_v46, %v583_v45  ;;  %v412_v49 = vpop.f32.mrf.mxu0  ;;  %v585_v50 = vpop.f32.mrf.mxu1 }
 0x10a   : > { %v586_v52 = vadd.f32 %v585_v50, %v412_v49 }
 0x10b   : > { %v853_v51 = vadd.f32 %v2023_v63, %v826_v48 }
 0x10d   : > { %877 = vst [vmem:[%s2028_s23 + $0x68] sm:$0xff] %v853_v51 }
 0x110   : > { %v788_v53 = vpop.f32.mrf.mxu2  ;;  %v2107_v54 = vpop.f32.mrf.mxu3 }
 0x111   : > { %v827_v56 = vadd.f32 %v788_v53, %v586_v52  ;;  %v414_v57 = vpop.f32.mrf.mxu0  ;;  %v587_v58 = vpop.f32.mrf.mxu1  ;;  %v1039_v52 = vadd.f32 %v2099_v39, %v2059_v37 }
 0x112   : > { %v588_v60 = vadd.f32 %v587_v58, %v414_v57 }
 0x113   : > { %v854_v59 = vadd.f32 %v2023_v63, %v827_v56 }
 0x115   : > { %878 = vst [vmem:[%s2028_s23 + $0x70] sm:$0xff] %v854_v59 }
 0x118   : > { %v790_v61 = vpop.f32.mrf.mxu2  ;;  %v2111_v0 = vpop.f32.mrf.mxu3 }
 0x119   : > { %v828_v2 = vadd.f32 %v790_v61, %v588_v60  ;;  %v417_v3 = vpop.f32.mrf.mxu0  ;;  %v590_v4 = vpop.f32.mrf.mxu1  ;;  %v1041_v61 = vadd.f32 %v2103_v47, %v2063_v44  ;;  %v1044_v44 = vadd.f32 %v2107_v54, %v2075_v55  ;;  %v1046_v55 = vadd.f32 %v2111_v0, %v2079_v62 }
 0x11a   : > { %v591_v6 = vadd.f32 %v590_v4, %v417_v3 }
 0x11b   : > { %v855_v5 = vadd.f32 %v2023_v63, %v828_v2 }
 0x11d   : > { %879 = vst [vmem:[%s2028_s23 + $0x78] sm:$0xff] %v855_v5 }
 0x120   : > { %v793_v10 = vpop.f32.mrf.mxu2  ;;  %v1108_v11 = vpop.f32.mrf.mxu3 }
 0x121   : > { %v829_v12 = vadd.f32 %v793_v10, %v591_v6  ;;  %v1128_v13 = vadd.f32 %v1108_v11, %v1029_v9  ;;  %v419_v14 = vpop.f32.mrf.mxu0  ;;  %v592_v16 = vpop.f32.mrf.mxu1 }
 0x122   : > { %v593_v21 = vadd.f32 %v592_v16, %v419_v14 }
 0x123   : > { %v856_v17 = vadd.f32 %v2023_v63, %v829_v12  ;;  %v1136_v18 = vadd.f32 %v2023_v63, %v1128_v13 }
 0x125   : > { %880 = vst [vmem:[%s2028_s23 + $0x80] sm:$0xff] %v856_v17 }
 0x126   : > { %1612 = vst [vmem:[%s2028_s23 + $0xc0] sm:$0xff] %v1136_v18 }
 0x128   : > { %v795_v22 = vpop.f32.mrf.mxu2  ;;  %v1110_v1 = vpop.f32.mrf.mxu3 }
 0x129   : > { %v830_v7 = vadd.f32 %v795_v22, %v593_v21  ;;  %v1129_v24 = vadd.f32 %v1110_v1, %v1031_v20  ;;  %v422_v25 = vpop.f32.mrf.mxu0  ;;  %v595_v27 = vpop.f32.mrf.mxu1 }
 0x12a   : > { %v596_v30 = vadd.f32 %v595_v27, %v422_v25 }
 0x12b   : > { %v857_v28 = vadd.f32 %v2023_v63, %v830_v7  ;;  %v1137_v29 = vadd.f32 %v2023_v63, %v1129_v24 }
 0x12d   : > { %881 = vst [vmem:[%s2028_s23 + $0x88] sm:$0xff] %v857_v28 }
 0x12e   : > { %1613 = vst [vmem:[%s2028_s23 + $0xc8] sm:$0xff] %v1137_v29 }
 0x130   : > { %v798_v8 = vpop.f32.mrf.mxu2  ;;  %v1113_v15 = vpop.f32.mrf.mxu3 }
 0x131   : > { %v831_v33 = vadd.f32 %v798_v8, %v596_v30  ;;  %v1130_v34 = vadd.f32 %v1113_v15, %v1034_v32  ;;  %v424_v35 = vpop.f32.mrf.mxu0  ;;  %v597_v36 = vpop.f32.mrf.mxu1 }
 0x132   : > { %v598_v42 = vadd.f32 %v597_v36, %v424_v35 }
 0x133   : > { %v858_v38 = vadd.f32 %v2023_v63, %v831_v33  ;;  %v1138_v40 = vadd.f32 %v2023_v63, %v1130_v34 }
 0x135   : > { %882 = vst [vmem:[%s2028_s23 + $0x90] sm:$0xff] %v858_v38 }
 0x136   : > { %1614 = vst [vmem:[%s2028_s23 + $0xd0] sm:$0xff] %v1138_v40 }
 0x138   : > { %v800_v43 = vpop.f32.mrf.mxu2  ;;  %v1115_v19 = vpop.f32.mrf.mxu3 }
 0x139   : > { %v832_v23 = vadd.f32 %v800_v43, %v598_v42  ;;  %v1131_v45 = vadd.f32 %v1115_v19, %v1036_v41  ;;  %v427_v46 = vpop.f32.mrf.mxu0  ;;  %v600_v48 = vpop.f32.mrf.mxu1 }
 0x13a   : > { %v601_v51 = vadd.f32 %v600_v48, %v427_v46 }
 0x13b   : > { %v859_v49 = vadd.f32 %v2023_v63, %v832_v23  ;;  %v1139_v50 = vadd.f32 %v2023_v63, %v1131_v45 }
 0x13d   : > { %883 = vst [vmem:[%s2028_s23 + $0x98] sm:$0xff] %v859_v49 }
 0x13e   : > { %1615 = vst [vmem:[%s2028_s23 + $0xd8] sm:$0xff] %v1139_v50 }
 0x140   : > { %v803_v26 = vpop.f32.mrf.mxu2  ;;  %v1118_v31 = vpop.f32.mrf.mxu3 }
 0x141   : > { %v833_v53 = vadd.f32 %v803_v26, %v601_v51  ;;  %v1132_v56 = vadd.f32 %v1118_v31, %v1039_v52  ;;  %v429_v57 = vpop.f32.mrf.mxu0  ;;  %v602_v58 = vpop.f32.mrf.mxu1 }
 0x142   : > { %v603_v2 = vadd.f32 %v602_v58, %v429_v57 }
 0x143   : > { %v860_v59 = vadd.f32 %v2023_v63, %v833_v53  ;;  %v1140_v60 = vadd.f32 %v2023_v63, %v1132_v56 }
 0x145   : > { %884 = vst [vmem:[%s2028_s23 + $0xa0] sm:$0xff] %v860_v59 }
 0x146   : > { %1616 = vst [vmem:[%s2028_s23 + $0xe0] sm:$0xff] %v1140_v60 }
 0x148   : > { %v805_v3 = vpop.f32.mrf.mxu2  ;;  %v1120_v37 = vpop.f32.mrf.mxu3 }
 0x149   : > { %v834_v39 = vadd.f32 %v805_v3, %v603_v2  ;;  %v1133_v4 = vadd.f32 %v1120_v37, %v1041_v61  ;;  %v432_v5 = vpop.f32.mrf.mxu0  ;;  %v605_v6 = vpop.f32.mrf.mxu1 }
 0x14a   : > { %v606_v11 = vadd.f32 %v605_v6, %v432_v5 }
 0x14b   : > { %v861_v9 = vadd.f32 %v2023_v63, %v834_v39  ;;  %v1141_v10 = vadd.f32 %v2023_v63, %v1133_v4 }
 0x14d   : > { %885 = vst [vmem:[%s2028_s23 + $0xa8] sm:$0xff] %v861_v9 }
 0x14e   : > { %1617 = vst [vmem:[%s2028_s23 + $0xe8] sm:$0xff] %v1141_v10 }
 0x150   : > { %v808_v47 = vpop.f32.mrf.mxu2  ;;  %v1123_v12 = vpop.f32.mrf.mxu3 }
 0x151   : > { %v835_v13 = vadd.f32 %v808_v47, %v606_v11  ;;  %v1134_v14 = vadd.f32 %v1123_v12, %v1044_v44  ;;  %v434_v18 = vpop.f32.mrf.mxu0  ;;  %v607_v20 = vpop.f32.mrf.mxu1 }
 0x152   : > { %v608_v54 = vadd.f32 %v607_v20, %v434_v18 }
 0x153   : > { %v862_v16 = vadd.f32 %v2023_v63, %v835_v13  ;;  %v1142_v17 = vadd.f32 %v2023_v63, %v1134_v14 }
 0x155   : > { %886 = vst [vmem:[%s2028_s23 + $0xb0] sm:$0xff] %v862_v16 }
 0x156   : > { %1618 = vst [vmem:[%s2028_s23 + $0xf0] sm:$0xff] %v1142_v17 }
 0x158   : > { %v810_v21 = vpop.f32.mrf.mxu2  ;;  %v1125_v22 = vpop.f32.mrf.mxu3 }
 0x159   : > { %v836_v1 = vadd.f32 %v810_v21, %v608_v54  ;;  %v1135_v7 = vadd.f32 %v1125_v22, %v1046_v55 }
 0x15b   : > { %v863_v24 = vadd.f32 %v2023_v63, %v836_v1  ;;  %v1143_v25 = vadd.f32 %v2023_v63, %v1135_v7 }
 0x15d   : > { %887 = vst [vmem:[%s2028_s23 + $0xb8] sm:$0xff] %v863_v24 }
 0x15e   : > { %1619 = vst [vmem:[%s2028_s23 + $0xf8] sm:$0xff] %v1143_v25 }
 0x15f   : > { %1766 = shalt.err (!%p1763_p5)
}
 0x160   : > { %s1819_s11 = smov 128   ;;  %s1820_s19 = smov 8  }
 0x161   : > { %1681 = dma.vmem_to_hbm [thread:$0]  (%p1881_p4), %s1171_s15, 4096, %s1173_s30, %s1154_s4, %s1819_s11, %s1819_s11, %s1820_s19  }
 0x162 PF: > { %p1687_p6 = scmp.ge.s32.totalorder %s1817_s17, 2  ;;  %s1187_s21 = sand.u32 1, %s1797_s12  }
 0x163   : > { %s1188_s23 = scalar_lea.sflag [#allocation3], %s1187_s21 }
 0x164   : > { %p1684_p7 = pnand %p1687_p6, %p1888_p8 }
 0x166   : > { %p1685_p9 = pneg %p1684_p7 }
 0x168   : > { %1792 = dma.done.wait (%p1685_p9), %s1188_s23, 4096  }
 0x169   : > { %1794 = vsyncadd (%p1685_p9), %s1188_s23, 4294963200  ;;  %s16_s17 = sadd.s32 1, %s1817_s17   ;;  %s2208_s12 = smov %s1801_s13 }
 0x16a   : > { %p13_p10 = scmp.ge.s32.totalorder %s16_s17, 4   ;;  %s2209_s13 = smov %s1805_s14 }
 0x16b   : > { %s2210_s14 = smov %s1894_s25  ;;  %s2211_s15 = smov %s1813_s16 }
 0x16c   : > { %s2212_s16 = smov %s2214_s20  ;;  %15 = sbr.rel (!%p13_p10) target bundleno = 4 (0x4), region = 77 }
 0x171   :  { %1194 = vsyncpa [#allocation3], 1 }
 0x172   :  { %1196 = vsyncpa [#allocation3 + $0x1], 1 }

</bundles_post_ra>
